<compile_context>
chip_gen: v6e
topology: v6e:2x2x1
jax: 0.10.0
libtpu: 0.0.40
codegen_flags: <defaults>
</compile_context>

<pallas_src>
import functools

import jax
import jax.numpy as jnp
from jax.experimental import pallas as pl
from jax.experimental.pallas import tpu as pltpu


def _round_up(x, m):
    return ((x + m - 1) // m) * m


def _focal_pow(base, gamma):
    """(base)**gamma.  Integer gamma -> repeated VPU multiplies (no EUP pow)."""
    g = float(gamma)
    if g.is_integer() and g >= 0:
        n = int(g)
        if n == 0:
            return jnp.ones_like(base)
        r = base
        for _ in range(n - 1):
            r = r * base
        return r
    # non-integer gamma: clamp to avoid NaN from pow of a tiny negative base
    # (documented divergence from a NaN-producing reference corner case).
    return jnp.maximum(base, 0.0) ** g


def _focal_kernel(*refs, num_heads, ignore_label, gamma, has_weight):
    """Per-pixel focal CE for all heads on one lane-dense tile of pixels.

    refs = (x_ref_0 ... x_ref_{H-1}, t_ref, [w_ref], out_ref)
      x_ref_h : (1, C, T) logits of head h          (classes on sublanes)
      t_ref   : (1, 1, T) int32 targets             (may contain ignore_label)
      w_ref   : (1, C, 1) float32 class weights     (only if has_weight)
      out_ref : (2*num_heads, T) float32
                rows [0, H)  -> focal pixel loss per head
                rows [H, 2H) -> softmax prob of the (clamped) target class
    """
    x_refs = refs[:num_heads]
    t_ref = refs[num_heads]
    w_ref = refs[num_heads + 1] if has_weight else None
    out_ref = refs[-1]

    c = x_refs[0].shape[1]

    # ---------------- head-invariant work (hoisted out of the head loop) ----
    t = t_ref[0]                                     # (1, T) int32
    valid = t != ignore_label
    t_clamped = jnp.where(valid, t, 0)               # ignore -> class 0
    cls = jax.lax.broadcasted_iota(jnp.int32, (c, t.shape[-1]), 0)
    onehot = cls == t_clamped                        # (C, T) bool

    w_t = None
    if has_weight:
        w_col = w_ref[0].astype(jnp.float32)         # (C, 1)
        # per-pixel weight of the target class (one XLU reduce, done once)
        w_t = jnp.sum(jnp.where(onehot, w_col, 0.0), axis=0, keepdims=True)

    # ---------------- per-head focal CE -------------------------------------
    for h in range(num_heads):
        x = x_refs[h][0].astype(jnp.float32)         # (C, T), upcast bf16 here
        # numerically-stable log-softmax pieces (class axis = sublanes)
        m = jnp.max(x, axis=0, keepdims=True)                       # (1, T)
        lse = m + jnp.log(jnp.sum(jnp.exp(x - m), axis=0, keepdims=True))
        x_t = jnp.sum(jnp.where(onehot, x, 0.0), axis=0, keepdims=True)
        nll = lse - x_t                                             # -log p[tgt]
        pred = jnp.exp(x_t - lse)                                   # p[tgt]

        if has_weight:
            logp = w_t * nll
            p = jnp.exp(-logp)       # inherent extra exp when weights != 1
        else:
            logp = nll
            p = pred                 # reuse the single exp

        focal = _focal_pow(1.0 - p, gamma) * logp                   # (1, T)

        out_ref[pl.ds(h, 1), :] = focal
        out_ref[pl.ds(num_heads + h, 1), :] = pred


def _pick_tile_and_vmem(hw, num_heads, c, x_itemsize, has_weight, max_tile_hw):
    """VMEM-aware pixel-tile size + explicit scoped-VMEM limit."""
    try:
        vmem_cap = int(pltpu.get_tpu_info().vmem_capacity_bytes)
    except Exception:
        vmem_cap = 64 * 1024 * 1024      # conservative: v7x has the least VMEM

    # double-buffered VMEM bytes needed per pixel of tile
    per_px = 2 * (num_heads * c * int(x_itemsize) + 4     # logits + int32 target
                  + 2 * num_heads * 4)                     # f32 focal+pred rows
    budget = int(vmem_cap * 0.6)         # leave headroom for compiler scratch
    tile = max(128, (budget // per_px) // 128 * 128)
    tile = min(tile, int(max_tile_hw), _round_up(hw, 128))
    tile = _round_up(tile, 128)

    footprint = per_px * tile + (2 * c * 4 if has_weight else 0)
    vmem_limit = int(max(32 << 20,
                         min(vmem_cap * 9 // 10,
                             footprint * 5 // 4 + (4 << 20))))
    return tile, vmem_limit


def ohem_focal_loss(outs, target, weight=None, *, ignore_label=-1, thresh=0.7,
                    min_kept=100000, gamma=2, max_tile_hw=32768):
    """Forward of OHEM_Focal_Loss: sum of get_loss over the logit tensors."""
    min_kept = max(1, min_kept)
    num_heads = len(outs)
    n, c, h, w_sp = outs[0].shape
    hw = h * w_sp
    p_tot = n * hw

    has_weight = weight is not None
    x_itemsize = jnp.dtype(outs[0].dtype).itemsize      # bf16 inputs welcome
    tile, vmem_limit = _pick_tile_and_vmem(hw, num_heads, c, x_itemsize,
                                           has_weight, max_tile_hw)
    num_tiles = -(-hw // tile)
    hw_ceil = num_tiles * tile

    # NCHW -> (N, C, HW): pure reshape, no transpose, no jnp.pad of the logits.
    # If tile does not divide HW the last block reads past the array end; those
    # output columns are sliced off below before any reduction.
    xs = [x.reshape(n, c, hw) for x in outs]
    t3 = target.reshape(n, 1, hw).astype(jnp.int32)

    in_specs = [pl.BlockSpec((1, c, tile), lambda nn, ii: (nn, 0, ii))
                for _ in range(num_heads)]
    in_specs.append(pl.BlockSpec((1, 1, tile), lambda nn, ii: (nn, 0, ii)))
    args = list(xs) + [t3]
    if has_weight:
        in_specs.append(pl.BlockSpec((1, c, 1), lambda nn, ii: (0, 0, 0)))
        args.append(jnp.asarray(weight, jnp.float32).reshape(1, c, 1))

    kernel = functools.partial(_focal_kernel, num_heads=num_heads,
                               ignore_label=int(ignore_label), gamma=gamma,
                               has_weight=has_weight)

    out = pl.pallas_call(
        kernel,
        out_shape=jax.ShapeDtypeStruct((2 * num_heads, n * hw_ceil), jnp.float32),
        grid_spec=pltpu.PrefetchScalarGridSpec(
            num_scalar_prefetch=0,
            grid=(n, num_tiles),
            in_specs=in_specs,
            out_specs=pl.BlockSpec((2 * num_heads, tile),
                                   lambda nn, ii: (0, nn * num_tiles + ii)),
        ),
        compiler_params=pltpu.CompilerParams(
            dimension_semantics=("parallel", "parallel"),
            vmem_limit_bytes=vmem_limit),
    )(*args)

    # -------- OHEM selection (plain-JAX glue, per head, no top_k/sort) --------
    # (2H, N, HW_ceil) view -> per-head flat pixel arrays without any transpose.
    out3 = out.reshape(2 * num_heads, n, hw_ceil)
    focal_all = out3[:num_heads, :, :hw].reshape(num_heads, p_tot)
    pred_all = out3[num_heads:, :, :hw].reshape(num_heads, p_tot)

    t_flat = target.reshape(-1).astype(jnp.int32)
    valid = t_flat != ignore_label
    num_valid = jnp.sum(valid.astype(jnp.int32))
    thresh_f = jnp.float32(thresh)

    # k-th smallest valid target-probability (PyTorch: sorted[min(min_kept, numel-1)])
    if min_kept >= p_tot:
        # k == num_valid - 1 for every possible target -> it is simply the max.
        min_value = jnp.max(jnp.where(valid[None, :], pred_all, -jnp.inf), axis=1)
    else:
        # Exact, sort-free k-th order statistic: bisection on the (monotone)
        # non-negative float bit patterns, counting elements <= mid each step.
        k = jnp.minimum(jnp.int32(min_kept), num_valid - 1)
        pbits = jax.lax.bitcast_convert_type(pred_all.astype(jnp.float32),
                                             jnp.int32)
        # invalid pixels -> +inf bit pattern: never counted inside the range
        pbits = jnp.where(valid[None, :], pbits, jnp.int32(0x7F800000))

        def body(_, lo_hi):
            lo, hi = lo_hi
            mid = lo + ((hi - lo) >> 1)
            cnt = jnp.sum((pbits <= mid[:, None]).astype(jnp.int32), axis=1)
            go_hi = cnt >= k + 1
            return jnp.where(go_hi, lo, mid + 1), jnp.where(go_hi, mid, hi)

        lo0 = jnp.zeros((num_heads,), jnp.int32)
        hi0 = jnp.full((num_heads,), jnp.int32(0x7F7FFFFF))   # max finite f32
        _, hi = jax.lax.fori_loop(0, 32, body, (lo0, hi0))
        min_value = jax.lax.bitcast_convert_type(hi, jnp.float32)

    threshold = jnp.maximum(min_value, thresh_f)                  # (H,)
    keep = valid[None, :] & (pred_all < threshold[:, None])       # (H, P)
    cnt = jnp.sum(keep.astype(jnp.float32), axis=1)
    s = jnp.sum(jnp.where(keep, focal_all, 0.0), axis=1)
    # guard the all-ignored corner case (would be 0/0 otherwise)
    per_head = jnp.where(cnt > 0, s / jnp.maximum(cnt, 1.0), 0.0)
    return jnp.sum(per_head)


# -------------------- pure-JAX reference (for verification) --------------------
def _ref_single_loss(x, target, weight, *, ignore_label, thresh, min_kept, gamma):
    n, c, h, w_sp = x.shape
    logits = jnp.transpose(x, (0, 2, 3, 1)).reshape(-1, c).astype(jnp.float32)
    t = target.reshape(-1).astype(jnp.int32)
    valid = t != ignore_label
    tc = jnp.where(valid, t, 0)
    logprobs = jax.nn.log_softmax(logits, axis=-1)
    nll = -jnp.take_along_axis(logprobs, tc[:, None], axis=-1)[:, 0]
    w_vec = jnp.ones((c,), jnp.float32) if weight is None else jnp.asarray(weight, jnp.float32)
    logp = w_vec[tc] * nll
    p = jnp.exp(-logp)
    focal = (1.0 - p) ** gamma * logp
    pred_t = jnp.exp(-nll)

    num_valid = jnp.sum(valid.astype(jnp.int32))
    sorted_pred = jnp.sort(jnp.where(valid, pred_t, jnp.inf))
    k = jnp.minimum(jnp.int32(min_kept), num_valid - 1)
    threshold = jnp.maximum(jnp.take(sorted_pred, k), jnp.float32(thresh))
    keep = valid & (pred_t < threshold)
    return jnp.sum(jnp.where(keep, focal, 0.0)) / jnp.sum(keep.astype(jnp.float32))


def _ref_loss(outs, target, weight=None, *, ignore_label=-1, thresh=0.7,
              min_kept=100000, gamma=2):
    min_kept = max(1, min_kept)
    return sum(_ref_single_loss(x, target, weight, ignore_label=ignore_label,
                                thresh=thresh, min_kept=min_kept, gamma=gamma)
               for x in outs)


if __name__ == "__main__":
    key = jax.random.PRNGKey(0)
    N, C, H, W = 2, 4, 16, 16
    ignore_label = -1

    keys = jax.random.split(key, 8)
    # five logit maps (as produced by five decoder heads)
    outs = tuple(jax.random.normal(keys[i], (N, C, H, W), jnp.float32) * 2.0
                 for i in range(5))
    # integer targets with some ignored pixels
    target = jax.random.randint(keys[5], (N, H, W), 0, C, jnp.int32)
    ignore_mask = jax.random.uniform(keys[6], (N, H, W)) < 0.1
    target = jnp.where(ignore_mask, ignore_label, target)

    # 1) unweighted, min_kept >> #pixels (fast max-statistic path)
    loss = jax.block_until_ready(
        ohem_focal_loss(outs, target, None, ignore_label=ignore_label,
                        thresh=0.7, min_kept=100000, gamma=2))
    ref = jax.block_until_ready(
        _ref_loss(outs, target, None, ignore_label=ignore_label,
                  thresh=0.7, min_kept=100000, gamma=2))
    assert jnp.isfinite(loss), f"non-finite loss: {loss}"
    assert jnp.allclose(loss, ref, rtol=1e-4, atol=1e-5), (loss, ref)

    # 2) weighted path
    w_vec = jnp.array([1.0, 2.0, 0.5, 1.5], jnp.float32)
    loss_w = jax.block_until_ready(
        ohem_focal_loss(outs, target, w_vec, ignore_label=ignore_label,
                        thresh=0.7, min_kept=100000, gamma=2))
    ref_w = jax.block_until_ready(
        _ref_loss(outs, target, w_vec, ignore_label=ignore_label,
                  thresh=0.7, min_kept=100000, gamma=2))
    assert jnp.isfinite(loss_w), f"non-finite weighted loss: {loss_w}"
    assert jnp.allclose(loss_w, ref_w, rtol=1e-4, atol=1e-5), (loss_w, ref_w)

    # 3) unweighted, min_kept < #pixels: exercises the sort-free bisection path
    loss_k = jax.block_until_ready(
        ohem_focal_loss(outs, target, None, ignore_label=ignore_label,
                        thresh=0.05, min_kept=50, gamma=2))
    ref_k = jax.block_until_ready(
        _ref_loss(outs, target, None, ignore_label=ignore_label,
                  thresh=0.05, min_kept=50, gamma=2))
    assert jnp.isfinite(loss_k), f"non-finite loss (min_kept path): {loss_k}"
    assert jnp.allclose(loss_k, ref_k, rtol=1e-4, atol=1e-5), (loss_k, ref_k)

    print("KERNEL_OK")
</pallas_src>

<mosaic_0001>
module attributes {stable_mosaic.version = 11 : i64} {
  func.func @_focal_kernel(%arg0: i32, %arg1: i32, %arg2: memref<1x4x256xf32, #tpu.memory_space<vmem>>, %arg3: memref<1x4x256xf32, #tpu.memory_space<vmem>>, %arg4: memref<1x4x256xf32, #tpu.memory_space<vmem>>, %arg5: memref<1x4x256xf32, #tpu.memory_space<vmem>>, %arg6: memref<1x4x256xf32, #tpu.memory_space<vmem>>, %arg7: memref<1x1x256xi32, #tpu.memory_space<vmem>>, %arg8: memref<10x256xf32, #tpu.memory_space<vmem>>) attributes {dimension_semantics = [#tpu.dimension_semantics<parallel>, #tpu.dimension_semantics<parallel>], iteration_bounds = array<i64: 2, 1>, scalar_prefetch = 0 : i64, scratch_operands = 0 : i64, tpu.core_type = #tpu.core_type<tc>, window_params = [{transform_indices = @transform_0, window_bounds = array<i64: 1, 4, 256>}, {transform_indices = @transform_1, window_bounds = array<i64: 1, 4, 256>}, {transform_indices = @transform_2, window_bounds = array<i64: 1, 4, 256>}, {transform_indices = @transform_3, window_bounds = array<i64: 1, 4, 256>}, {transform_indices = @transform_4, window_bounds = array<i64: 1, 4, 256>}, {transform_indices = @transform_5, window_bounds = array<i64: 1, 1, 256>}, {transform_indices = @transform_6, window_bounds = array<i64: 10, 256>}]} {
    %c0 = arith.constant 0 : index
    %c0_0 = arith.constant 0 : index
    %c0_1 = arith.constant 0 : index
    %0 = vector.load %arg7[%c0, %c0_0, %c0_1] : memref<1x1x256xi32, #tpu.memory_space<vmem>>, vector<1x1x256xi32>
    %1 = vector.shape_cast %0 : vector<1x1x256xi32> to vector<1x256xi32>
    %c-1_i32 = arith.constant -1 : i32
    %2 = vector.broadcast %c-1_i32 : i32 to vector<1x256xi32>
    %3 = arith.cmpi ne, %1, %2 : vector<1x256xi32>
    %c0_i32 = arith.constant 0 : i32
    %4 = vector.broadcast %c0_i32 : i32 to vector<1x256xi32>
    %5 = arith.select %3, %1, %4 : vector<1x256xi1>, vector<1x256xi32>
    %6 = tpu.iota {dimensions = array<i32: 0>} : vector<4x256xi32>
    %7 = vector.broadcast %5 : vector<1x256xi32> to vector<4x256xi32>
    %8 = arith.cmpi eq, %6, %7 : vector<4x256xi32>
    %c0_2 = arith.constant 0 : index
    %c0_3 = arith.constant 0 : index
    %c0_4 = arith.constant 0 : index
    %9 = vector.load %arg2[%c0_2, %c0_3, %c0_4] : memref<1x4x256xf32, #tpu.memory_space<vmem>>, vector<1x4x256xf32>
    %10 = vector.shape_cast %9 : vector<1x4x256xf32> to vector<4x256xf32>
    %cst = arith.constant dense<0xFF800000> : vector<256xf32>
    %11 = vector.multi_reduction <maximumf>, %10, %cst [0] : vector<4x256xf32> to vector<256xf32>
    %12 = vector.shape_cast %11 : vector<256xf32> to vector<1x256xf32>
    %13 = vector.broadcast %12 : vector<1x256xf32> to vector<4x256xf32>
    %14 = arith.subf %10, %13 : vector<4x256xf32>
    %15 = math.exp %14 : vector<4x256xf32>
    %cst_5 = arith.constant dense<0.000000e+00> : vector<256xf32>
    %16 = vector.multi_reduction <add>, %15, %cst_5 [0] : vector<4x256xf32> to vector<256xf32>
    %17 = vector.shape_cast %16 : vector<256xf32> to vector<1x256xf32>
    %18 = math.log %17 : vector<1x256xf32>
    %19 = arith.addf %12, %18 : vector<1x256xf32>
    %cst_6 = arith.constant 0.000000e+00 : f32
    %20 = vector.broadcast %cst_6 : f32 to vector<4x256xf32>
    %21 = arith.select %8, %10, %20 : vector<4x256xi1>, vector<4x256xf32>
    %cst_7 = arith.constant dense<0.000000e+00> : vector<256xf32>
    %22 = vector.multi_reduction <add>, %21, %cst_7 [0] : vector<4x256xf32> to vector<256xf32>
    %23 = vector.shape_cast %22 : vector<256xf32> to vector<1x256xf32>
    %24 = arith.subf %19, %23 : vector<1x256xf32>
    %25 = arith.subf %23, %19 : vector<1x256xf32>
    %26 = math.exp %25 : vector<1x256xf32>
    %cst_8 = arith.constant 1.000000e+00 : f32
    %27 = vector.broadcast %cst_8 : f32 to vector<1x256xf32>
    %28 = arith.subf %27, %26 : vector<1x256xf32>
    %29 = arith.mulf %28, %28 : vector<1x256xf32>
    %30 = arith.mulf %29, %24 : vector<1x256xf32>
    %c0_9 = arith.constant 0 : index
    %c0_10 = arith.constant 0 : index
    %31 = vector.load %arg8[%c0_9, %c0_10] : memref<10x256xf32, #tpu.memory_space<vmem>>, vector<1x256xf32>
    tpu.vector_store %arg8[%c0_9, %c0_10], %30 {strides = array<i32>} : memref<10x256xf32, #tpu.memory_space<vmem>>, vector<1x256xf32>,
    %c5 = arith.constant 5 : index
    %c0_11 = arith.constant 0 : index
    %32 = vector.load %arg8[%c5, %c0_11] : memref<10x256xf32, #tpu.memory_space<vmem>>, vector<1x256xf32>
    tpu.vector_store %arg8[%c5, %c0_11], %26 {strides = array<i32>} : memref<10x256xf32, #tpu.memory_space<vmem>>, vector<1x256xf32>,
    %c0_12 = arith.constant 0 : index
    %c0_13 = arith.constant 0 : index
    %c0_14 = arith.constant 0 : index
    %33 = vector.load %arg3[%c0_12, %c0_13, %c0_14] : memref<1x4x256xf32, #tpu.memory_space<vmem>>, vector<1x4x256xf32>
    %34 = vector.shape_cast %33 : vector<1x4x256xf32> to vector<4x256xf32>
    %cst_15 = arith.constant dense<0xFF800000> : vector<256xf32>
    %35 = vector.multi_reduction <maximumf>, %34, %cst_15 [0] : vector<4x256xf32> to vector<256xf32>
    %36 = vector.shape_cast %35 : vector<256xf32> to vector<1x256xf32>
    %37 = vector.broadcast %36 : vector<1x256xf32> to vector<4x256xf32>
    %38 = arith.subf %34, %37 : vector<4x256xf32>
    %39 = math.exp %38 : vector<4x256xf32>
    %cst_16 = arith.constant dense<0.000000e+00> : vector<256xf32>
    %40 = vector.multi_reduction <add>, %39, %cst_16 [0] : vector<4x256xf32> to vector<256xf32>
    %41 = vector.shape_cast %40 : vector<256xf32> to vector<1x256xf32>
    %42 = math.log %41 : vector<1x256xf32>
    %43 = arith.addf %36, %42 : vector<1x256xf32>
    %cst_17 = arith.constant 0.000000e+00 : f32
    %44 = vector.broadcast %cst_17 : f32 to vector<4x256xf32>
    %45 = arith.select %8, %34, %44 : vector<4x256xi1>, vector<4x256xf32>
    %cst_18 = arith.constant dense<0.000000e+00> : vector<256xf32>
    %46 = vector.multi_reduction <add>, %45, %cst_18 [0] : vector<4x256xf32> to vector<256xf32>
    %47 = vector.shape_cast %46 : vector<256xf32> to vector<1x256xf32>
    %48 = arith.subf %43, %47 : vector<1x256xf32>
    %49 = arith.subf %47, %43 : vector<1x256xf32>
    %50 = math.exp %49 : vector<1x256xf32>
    %cst_19 = arith.constant 1.000000e+00 : f32
    %51 = vector.broadcast %cst_19 : f32 to vector<1x256xf32>
    %52 = arith.subf %51, %50 : vector<1x256xf32>
    %53 = arith.mulf %52, %52 : vector<1x256xf32>
    %54 = arith.mulf %53, %48 : vector<1x256xf32>
    %c1 = arith.constant 1 : index
    %c0_20 = arith.constant 0 : index
    %55 = vector.load %arg8[%c1, %c0_20] : memref<10x256xf32, #tpu.memory_space<vmem>>, vector<1x256xf32>
    tpu.vector_store %arg8[%c1, %c0_20], %54 {strides = array<i32>} : memref<10x256xf32, #tpu.memory_space<vmem>>, vector<1x256xf32>,
    %c6 = arith.constant 6 : index
    %c0_21 = arith.constant 0 : index
    %56 = vector.load %arg8[%c6, %c0_21] : memref<10x256xf32, #tpu.memory_space<vmem>>, vector<1x256xf32>
    tpu.vector_store %arg8[%c6, %c0_21], %50 {strides = array<i32>} : memref<10x256xf32, #tpu.memory_space<vmem>>, vector<1x256xf32>,
    %c0_22 = arith.constant 0 : index
    %c0_23 = arith.constant 0 : index
    %c0_24 = arith.constant 0 : index
    %57 = vector.load %arg4[%c0_22, %c0_23, %c0_24] : memref<1x4x256xf32, #tpu.memory_space<vmem>>, vector<1x4x256xf32>
    %58 = vector.shape_cast %57 : vector<1x4x256xf32> to vector<4x256xf32>
    %cst_25 = arith.constant dense<0xFF800000> : vector<256xf32>
    %59 = vector.multi_reduction <maximumf>, %58, %cst_25 [0] : vector<4x256xf32> to vector<256xf32>
    %60 = vector.shape_cast %59 : vector<256xf32> to vector<1x256xf32>
    %61 = vector.broadcast %60 : vector<1x256xf32> to vector<4x256xf32>
    %62 = arith.subf %58, %61 : vector<4x256xf32>
    %63 = math.exp %62 : vector<4x256xf32>
    %cst_26 = arith.constant dense<0.000000e+00> : vector<256xf32>
    %64 = vector.multi_reduction <add>, %63, %cst_26 [0] : vector<4x256xf32> to vector<256xf32>
    %65 = vector.shape_cast %64 : vector<256xf32> to vector<1x256xf32>
    %66 = math.log %65 : vector<1x256xf32>
    %67 = arith.addf %60, %66 : vector<1x256xf32>
    %cst_27 = arith.constant 0.000000e+00 : f32
    %68 = vector.broadcast %cst_27 : f32 to vector<4x256xf32>
    %69 = arith.select %8, %58, %68 : vector<4x256xi1>, vector<4x256xf32>
    %cst_28 = arith.constant dense<0.000000e+00> : vector<256xf32>
    %70 = vector.multi_reduction <add>, %69, %cst_28 [0] : vector<4x256xf32> to vector<256xf32>
    %71 = vector.shape_cast %70 : vector<256xf32> to vector<1x256xf32>
    %72 = arith.subf %67, %71 : vector<1x256xf32>
    %73 = arith.subf %71, %67 : vector<1x256xf32>
    %74 = math.exp %73 : vector<1x256xf32>
    %cst_29 = arith.constant 1.000000e+00 : f32
    %75 = vector.broadcast %cst_29 : f32 to vector<1x256xf32>
    %76 = arith.subf %75, %74 : vector<1x256xf32>
    %77 = arith.mulf %76, %76 : vector<1x256xf32>
    %78 = arith.mulf %77, %72 : vector<1x256xf32>
    %c2 = arith.constant 2 : index
    %c0_30 = arith.constant 0 : index
    %79 = vector.load %arg8[%c2, %c0_30] : memref<10x256xf32, #tpu.memory_space<vmem>>, vector<1x256xf32>
    tpu.vector_store %arg8[%c2, %c0_30], %78 {strides = array<i32>} : memref<10x256xf32, #tpu.memory_space<vmem>>, vector<1x256xf32>,
    %c7 = arith.constant 7 : index
    %c0_31 = arith.constant 0 : index
    %80 = vector.load %arg8[%c7, %c0_31] : memref<10x256xf32, #tpu.memory_space<vmem>>, vector<1x256xf32>
    tpu.vector_store %arg8[%c7, %c0_31], %74 {strides = array<i32>} : memref<10x256xf32, #tpu.memory_space<vmem>>, vector<1x256xf32>,
    %c0_32 = arith.constant 0 : index
    %c0_33 = arith.constant 0 : index
    %c0_34 = arith.constant 0 : index
    %81 = vector.load %arg5[%c0_32, %c0_33, %c0_34] : memref<1x4x256xf32, #tpu.memory_space<vmem>>, vector<1x4x256xf32>
    %82 = vector.shape_cast %81 : vector<1x4x256xf32> to vector<4x256xf32>
    %cst_35 = arith.constant dense<0xFF800000> : vector<256xf32>
    %83 = vector.multi_reduction <maximumf>, %82, %cst_35 [0] : vector<4x256xf32> to vector<256xf32>
    %84 = vector.shape_cast %83 : vector<256xf32> to vector<1x256xf32>
    %85 = vector.broadcast %84 : vector<1x256xf32> to vector<4x256xf32>
    %86 = arith.subf %82, %85 : vector<4x256xf32>
    %87 = math.exp %86 : vector<4x256xf32>
    %cst_36 = arith.constant dense<0.000000e+00> : vector<256xf32>
    %88 = vector.multi_reduction <add>, %87, %cst_36 [0] : vector<4x256xf32> to vector<256xf32>
    %89 = vector.shape_cast %88 : vector<256xf32> to vector<1x256xf32>
    %90 = math.log %89 : vector<1x256xf32>
    %91 = arith.addf %84, %90 : vector<1x256xf32>
    %cst_37 = arith.constant 0.000000e+00 : f32
    %92 = vector.broadcast %cst_37 : f32 to vector<4x256xf32>
    %93 = arith.select %8, %82, %92 : vector<4x256xi1>, vector<4x256xf32>
    %cst_38 = arith.constant dense<0.000000e+00> : vector<256xf32>
    %94 = vector.multi_reduction <add>, %93, %cst_38 [0] : vector<4x256xf32> to vector<256xf32>
    %95 = vector.shape_cast %94 : vector<256xf32> to vector<1x256xf32>
    %96 = arith.subf %91, %95 : vector<1x256xf32>
    %97 = arith.subf %95, %91 : vector<1x256xf32>
    %98 = math.exp %97 : vector<1x256xf32>
    %cst_39 = arith.constant 1.000000e+00 : f32
    %99 = vector.broadcast %cst_39 : f32 to vector<1x256xf32>
    %100 = arith.subf %99, %98 : vector<1x256xf32>
    %101 = arith.mulf %100, %100 : vector<1x256xf32>
    %102 = arith.mulf %101, %96 : vector<1x256xf32>
    %c3 = arith.constant 3 : index
    %c0_40 = arith.constant 0 : index
    %103 = vector.load %arg8[%c3, %c0_40] : memref<10x256xf32, #tpu.memory_space<vmem>>, vector<1x256xf32>
    tpu.vector_store %arg8[%c3, %c0_40], %102 {strides = array<i32>} : memref<10x256xf32, #tpu.memory_space<vmem>>, vector<1x256xf32>,
    %c8 = arith.constant 8 : index
    %c0_41 = arith.constant 0 : index
    %104 = vector.load %arg8[%c8, %c0_41] : memref<10x256xf32, #tpu.memory_space<vmem>>, vector<1x256xf32>
    tpu.vector_store %arg8[%c8, %c0_41], %98 {strides = array<i32>} : memref<10x256xf32, #tpu.memory_space<vmem>>, vector<1x256xf32>,
    %c0_42 = arith.constant 0 : index
    %c0_43 = arith.constant 0 : index
    %c0_44 = arith.constant 0 : index
    %105 = vector.load %arg6[%c0_42, %c0_43, %c0_44] : memref<1x4x256xf32, #tpu.memory_space<vmem>>, vector<1x4x256xf32>
    %106 = vector.shape_cast %105 : vector<1x4x256xf32> to vector<4x256xf32>
    %cst_45 = arith.constant dense<0xFF800000> : vector<256xf32>
    %107 = vector.multi_reduction <maximumf>, %106, %cst_45 [0] : vector<4x256xf32> to vector<256xf32>
    %108 = vector.shape_cast %107 : vector<256xf32> to vector<1x256xf32>
    %109 = vector.broadcast %108 : vector<1x256xf32> to vector<4x256xf32>
    %110 = arith.subf %106, %109 : vector<4x256xf32>
    %111 = math.exp %110 : vector<4x256xf32>
    %cst_46 = arith.constant dense<0.000000e+00> : vector<256xf32>
    %112 = vector.multi_reduction <add>, %111, %cst_46 [0] : vector<4x256xf32> to vector<256xf32>
    %113 = vector.shape_cast %112 : vector<256xf32> to vector<1x256xf32>
    %114 = math.log %113 : vector<1x256xf32>
    %115 = arith.addf %108, %114 : vector<1x256xf32>
    %cst_47 = arith.constant 0.000000e+00 : f32
    %116 = vector.broadcast %cst_47 : f32 to vector<4x256xf32>
    %117 = arith.select %8, %106, %116 : vector<4x256xi1>, vector<4x256xf32>
    %cst_48 = arith.constant dense<0.000000e+00> : vector<256xf32>
    %118 = vector.multi_reduction <add>, %117, %cst_48 [0] : vector<4x256xf32> to vector<256xf32>
    %119 = vector.shape_cast %118 : vector<256xf32> to vector<1x256xf32>
    %120 = arith.subf %115, %119 : vector<1x256xf32>
    %121 = arith.subf %119, %115 : vector<1x256xf32>
    %122 = math.exp %121 : vector<1x256xf32>
    %cst_49 = arith.constant 1.000000e+00 : f32
    %123 = vector.broadcast %cst_49 : f32 to vector<1x256xf32>
    %124 = arith.subf %123, %122 : vector<1x256xf32>
    %125 = arith.mulf %124, %124 : vector<1x256xf32>
    %126 = arith.mulf %125, %120 : vector<1x256xf32>
    %c4 = arith.constant 4 : index
    %c0_50 = arith.constant 0 : index
    %127 = vector.load %arg8[%c4, %c0_50] : memref<10x256xf32, #tpu.memory_space<vmem>>, vector<1x256xf32>
    tpu.vector_store %arg8[%c4, %c0_50], %126 {strides = array<i32>} : memref<10x256xf32, #tpu.memory_space<vmem>>, vector<1x256xf32>,
    %c9 = arith.constant 9 : index
    %c0_51 = arith.constant 0 : index
    %128 = vector.load %arg8[%c9, %c0_51] : memref<10x256xf32, #tpu.memory_space<vmem>>, vector<1x256xf32>
    tpu.vector_store %arg8[%c9, %c0_51], %122 {strides = array<i32>} : memref<10x256xf32, #tpu.memory_space<vmem>>, vector<1x256xf32>,
    return
  }
  func.func @transform_0(%arg0: i32, %arg1: i32) -> (i32, i32, i32) {
    %c0_i32 = arith.constant 0 : i32
    %c0_i32_0 = arith.constant 0 : i32
    return %arg0, %c0_i32, %arg1 : i32, i32, i32
  }
  func.func @transform_1(%arg0: i32, %arg1: i32) -> (i32, i32, i32) {
    %c0_i32 = arith.constant 0 : i32
    %c0_i32_0 = arith.constant 0 : i32
    return %arg0, %c0_i32, %arg1 : i32, i32, i32
  }
  func.func @transform_2(%arg0: i32, %arg1: i32) -> (i32, i32, i32) {
    %c0_i32 = arith.constant 0 : i32
    %c0_i32_0 = arith.constant 0 : i32
    return %arg0, %c0_i32, %arg1 : i32, i32, i32
  }
  func.func @transform_3(%arg0: i32, %arg1: i32) -> (i32, i32, i32) {
    %c0_i32 = arith.constant 0 : i32
    %c0_i32_0 = arith.constant 0 : i32
    return %arg0, %c0_i32, %arg1 : i32, i32, i32
  }
  func.func @transform_4(%arg0: i32, %arg1: i32) -> (i32, i32, i32) {
    %c0_i32 = arith.constant 0 : i32
    %c0_i32_0 = arith.constant 0 : i32
    return %arg0, %c0_i32, %arg1 : i32, i32, i32
  }
  func.func @transform_5(%arg0: i32, %arg1: i32) -> (i32, i32, i32) {
    %c0_i32 = arith.constant 0 : i32
    %c0_i32_0 = arith.constant 0 : i32
    return %arg0, %c0_i32, %arg1 : i32, i32, i32
  }
  func.func @transform_6(%arg0: i32, %arg1: i32) -> (i32, i32) {
    %c1_i32 = arith.constant 1 : i32
    %0 = arith.muli %arg0, %c1_i32 : i32
    %1 = arith.addi %0, %arg1 : i32
    %c0_i32 = arith.constant 0 : i32
    %c0_i32_0 = arith.constant 0 : i32
    return %c0_i32, %1 : i32, i32
  }
}

</mosaic_0001>

<bundles_post_ra>
// kernel: tpu_custom_call.1
= control target key start
LH: loop header
LB: loop body
LE: loop exit
PB: predicated region body
PF: predicated region fallthrough
CT: control target
= control target key end

     0   :  { %s2318_s0 = inlined_call_operand.hbm [shape: f32[2,4,256], index: 0, kind: input, shape index: {}]   ;;  %s2319_s1 = inlined_call_operand.hbm [shape: f32[2,4,256], index: 1, kind: input, shape index: {}]   ;;  %s2320_s2 = inlined_call_operand.hbm [shape: f32[2,4,256], index: 2, kind: input, shape index: {}]   ;;  %s2321_s3 = inlined_call_operand.hbm [shape: f32[2,4,256], index: 3, kind: input, shape index: {}]   ;;  %s2322_s4 = inlined_call_operand.hbm [shape: f32[2,4,256], index: 4, kind: input, shape index: {}]   ;;  %s2323_s5 = inlined_call_operand.vmem [shape: s32[2,1,256], index: 5, kind: input, shape index: {}]   ;;  %s2324_s6 = inlined_call_operand.hbm [shape: f32[10,512], index: 6, kind: output, shape index: {}]  }
   0x1   :  { %2332 = sst [smem:[#allocation22_spill]] %s2319_s1 }
   0x2   :  { %2333 = sst [smem:[#allocation23_spill]] %s2321_s3 }
   0x3   :  { %11 = vsyncpa [#allocation3], 0 }
   0x4   :  { %13 = vsyncpa [#allocation3 + $0x1], 0 }
   0x5   :  { %14 = vsyncpa [#allocation6], 0 }
   0x6   :  { %16 = vsyncpa [#allocation6 + $0x1], 0 }
   0x7   :  { %17 = vsyncpa [#allocation9], 0 }
   0x8   :  { %19 = vsyncpa [#allocation9 + $0x1], 0 }
   0x9   :  { %20 = vsyncpa [#allocation4], 0 }
   0xa   :  { %22 = vsyncpa [#allocation4 + $0x1], 0  ;;  %s1783_s21 = smov 0   ;;  %s1785_s22 = smov 0  }
   0xb   :  { %s1787_s23 = smov 0   ;;  %s1789_s24 = smov 0  }
   0xc   :  { %s1791_s25 = smov 0   ;;  %s1793_s26 = smov 0  }
   0xd LB: > { %2334 = sst [smem:[#allocation16_spill]] %s1716_s21  ;;  %s1814_s27 = sadd.s32 4294967295, %s1736_s26   ;;  %s1736_s26 = sphi %s1793_s26, %s28_s26   ;;  %s1732_s25 = sphi %s1791_s25, %s2362_s25   ;;  %s1728_s24 = sphi %s1789_s24, %s2361_s24   ;;  %s1724_s23 = sphi %s1787_s23, %s2365_s23   ;;  %s1720_s22 = sphi %s1785_s22, %s2364_s22   ;;  %s1716_s21 = sphi %s1783_s21, %s2363_s21  }
   0xe   : > { %2335 = sst [smem:[#allocation17_spill]] %s1732_s25  ;;  %s1321_s28 = sadd.s32 4294967294, %s1736_s26  }
   0xf   : > { %2336 = sst [smem:[#allocation18_spill]] %s1736_s26  ;;  %s40_s29 = sadd.s32 1, %s1732_s25 }
  0x10   : > { %s49_s30 = sadd.s32 1, %s1724_s23  ;;  %p42_p0 = scmp.ge.s32.totalorder %s40_s29, 2 }
  0x11   : > { %p56_p1 = scmp.ne.s32.totalorder %s1724_s23, %s1720_s22  ;;  %p57_p2 = scmp.eq.s32.totalorder %s1736_s26, 0 }
  0x12   : > { %p62_p3 = scmp.ne.s32.totalorder %s1720_s22, %s1716_s21  ;;  %s2367_s29 = smov (%p42_p0, %s40_s29), 0 }
  0x13   : > { %2337 = sst [smem:[#allocation19_spill]] %s2367_s29  ;;  %p1826_p4 = por %p57_p2, %p56_p1 }
  0x14   : > { %p63_p5 = scmp.eq.s32.totalorder %s1814_s27, 0  ;;  %s44_s8 = ssub.s32 %s1732_s25, %s2367_s29 }
  0x15   : > { %p228_p6 = scmp.eq.s32.totalorder %s1814_s27, 1  ;;  %p47_p7 = scmp.eq.s32.totalorder %s44_s8, 0 }
  0x16   : > { %p1834_p8 = por %p63_p5, %p62_p3  ;;  %p234_p10 = scmp.eq.s32.totalorder %s1321_s28, 1 }
  0x17   : > { %p1838_p9 = por %p228_p6, %p56_p1  ;;  %p1399_p13 = scmp.lt.s32.totalorder %s1736_s26, 2 }
  0x18   : > { %s1843_s11 = scalar_select %p47_p7, %s1724_s23, %s49_s30  }
  0x19   : > { %p1845_p11 = por %p234_p10, %p62_p3  ;;  %s2325_s13 = sand.u32 1, %s1724_s23  }
  0x1a   : > { %2341 = sst [smem:[#allocation20_spill]] %s1843_s11  ;;  %s1854_s14 = sshll.u32 %s2325_s13, 3 }
  0x1b   : > { %s2342_s12 = scalar_select %p1845_p11, 1, 0 }
  0x1c   : > { %s1857_s15 = sshll.u32 %s1732_s25, 7  ;;  %p1861_p0 = pnand %p1399_p13, %p1826_p4 }
  0x1d   : > { %2343 = sst [smem:[#allocation21_spill]] %s2342_s12  ;;  %s275_s17 = sand.u32 1, %s1736_s26  }
  0x1e   : > { %s2345_s1 = sld [smem:[#allocation22_spill]]  ;;  %s279_s28 = scalar_lea.vmem [#allocation5], %s1854_s14 }
  0x1f   : > { %s289_s30 = sshll.u32 %s279_s28, 4  ;;  %p1339_p1 = scmp.ge.s32.totalorder %s1736_s26, 1  ;;  %s290_s30 = int_to_ptr.vmem [resolvable:$true] %s289_s30 }
  0x20   : > { %p369_p2 = scmp.lt.s32.totalorder %s1736_s26, 3  ;;  %s1873_s8 = scalar_lea.sflag [#allocation6], %s275_s17 }
  0x21   : > { %p1877_p3 = pneg %p1861_p0  ;;  %s1521_s13 = scalar_lea.vmem %s290_s30, 128 }
  0x22   : > { %p1522_p4 = scmp.ne.s32.totalorder %s290_s30, %s1521_s13  ;;  %s1738_s18 = smov [#allocation5]  }
  0x23   : > { %s1526_s19 = sshll.u32 %s1738_s18, 4  ;;  %s1527_s19 = int_to_ptr.vmem [resolvable:$false] %s1526_s19 }
  0x24   : > { %s287_s20 = scalar_lea.hbm %s2345_s1, %s1857_s15  ;;  %p1524_p5 = pnand %p1522_p4, %p1877_p3 }
  0x25   : > { %s1528_s28 = scalar_lea.vmem %s1527_s19, 256  ;;  %p1529_p7 = scmp.lt.s32.totalorder %s290_s30, %s1527_s19 }
  0x26   : > { %p1525_p6 = pneg %p1524_p5  ;;  %p1530_p10 = scmp.lt.s32.totalorder %s1528_s28, %s1521_s13 }
  0x28   : > { %p1531_p13 = por %p1530_p10, %p1529_p7 }
  0x2a   : > { %p1532_p12 = pnand %p1531_p13, %p1525_p6 }
  0x2c   : > { %1535 = shalt.err (!%p1532_p12)
}
  0x2d   : > { %1385 = dma.hbm_to_vmem [thread:$0]  (!%p1861_p0), %s287_s20, 128, %s290_s30, %s1873_s8  }
  0x2e   : > { %p1890_p4 = pnand %p1339_p1, %p369_p2  ;;  %s2348_s3 = sld [smem:[#allocation23_spill]] }
  0x2f   : > { %s321_s1 = scalar_lea.vmem [#allocation8], %s1854_s14  ;;  %s1899_s25 = scalar_lea.sflag [#allocation9], %s275_s17 }
  0x30   : > { %s331_s29 = sshll.u32 %s321_s1, 4  ;;  %s1739_s20 = smov [#allocation8]   ;;  %s332_s29 = int_to_ptr.vmem [resolvable:$true] %s331_s29 }
  0x31   : > { %s1549_s11 = scalar_lea.vmem %s332_s29, 128  ;;  %s1554_s30 = sshll.u32 %s1739_s20, 4  ;;  %s1555_s30 = int_to_ptr.vmem [resolvable:$false] %s1554_s30 }
  0x32   : > { %p1550_p12 = scmp.ne.s32.totalorder %s332_s29, %s1549_s11  ;;  %s1556_s26 = scalar_lea.vmem %s1555_s30, 256 }
  0x33   : > { %p1557_p1 = scmp.lt.s32.totalorder %s332_s29, %s1555_s30  ;;  %p1558_p2 = scmp.lt.s32.totalorder %s1556_s26, %s1549_s11 }
  0x34   : > { %s329_s28 = scalar_lea.hbm %s2348_s3, %s1857_s15  ;;  %p1552_p5 = pnand %p1550_p12, %p1877_p3 }
  0x35   : > { %p1559_p7 = por %p1558_p2, %p1557_p1 }
  0x36   : > { %p1553_p6 = pneg %p1552_p5 }
  0x38   : > { %p1560_p10 = pnand %p1559_p7, %p1553_p6 }
  0x3a   : > { %1563 = shalt.err (!%p1560_p10)
}
  0x3b   : > { %1391 = dma.hbm_to_vmem [thread:$0]  (!%p1861_p0), %s329_s28, 128, %s332_s29, %s1899_s25  }
  0x3c   : > { %s266_s19 = scalar_lea.hbm %s2318_s0, %s1857_s15  ;;  %s258_s13 = scalar_lea.vmem [#allocation2], %s1854_s14 }
  0x3d   : > { %s268_s20 = sshll.u32 %s258_s13, 4  ;;  %s2349_s30 = sand.u32 1, %s1724_s23   ;;  %s269_s20 = int_to_ptr.vmem [resolvable:$true] %s268_s20 }
  0x3e   : > { %s255_s26 = scalar_lea.sflag [#allocation3], %s2349_s30  ;;  %s1577_s11 = scalar_lea.vmem %s269_s20, 128 }
  0x3f   : > { %p1578_p13 = scmp.ne.s32.totalorder %s269_s20, %s1577_s11  ;;  %s1740_s3 = smov [#allocation2]  }
  0x40   : > { %s1582_s12 = sshll.u32 %s1740_s3, 4  ;;  %s1583_s12 = int_to_ptr.vmem [resolvable:$false] %s1582_s12 }
  0x41   : > { %p1580_p12 = pnand %p1578_p13, %p1877_p3  ;;  %s1584_s21 = scalar_lea.vmem %s1583_s12, 256 }
  0x42   : > { %p1585_p6 = scmp.lt.s32.totalorder %s269_s20, %s1583_s12  ;;  %p1586_p1 = scmp.lt.s32.totalorder %s1584_s21, %s1577_s11 }
  0x43   : > { %p1581_p5 = pneg %p1580_p12 }
  0x44   : > { %p1587_p2 = por %p1586_p1, %p1585_p6 }
  0x46   : > { %p1588_p7 = pnand %p1587_p2, %p1581_p5 }
  0x48   : > { %1591 = shalt.err (!%p1588_p7)
}
  0x49   : > { %1382 = dma.hbm_to_vmem [thread:$0]  (!%p1861_p0), %s266_s19, 128, %s269_s20, %s255_s26  }
  0x4a   : > { %s308_s1 = scalar_lea.hbm %s2320_s2, %s1857_s15  ;;  %s300_s17 = scalar_lea.vmem [#allocation7], %s1854_s14 }
  0x4b   : > { %s310_s13 = sshll.u32 %s300_s17, 4  ;;  %s1741_s21 = smov [#allocation7]   ;;  %s311_s13 = int_to_ptr.vmem [resolvable:$true] %s310_s13 }
  0x4c   : > { %s1605_s3 = scalar_lea.vmem %s311_s13, 128  ;;  %s1610_s12 = sshll.u32 %s1741_s21, 4  ;;  %s1611_s12 = int_to_ptr.vmem [resolvable:$false] %s1610_s12 }
  0x4d   : > { %p1606_p10 = scmp.ne.s32.totalorder %s311_s13, %s1605_s3  ;;  %s1612_s30 = scalar_lea.vmem %s1611_s12, 256 }
  0x4e   : > { %p1613_p5 = scmp.lt.s32.totalorder %s311_s13, %s1611_s12  ;;  %p1614_p6 = scmp.lt.s32.totalorder %s1612_s30, %s1605_s3 }
  0x4f   : > { %p1608_p13 = pnand %p1606_p10, %p1877_p3 }
  0x50   : > { %p1615_p1 = por %p1614_p6, %p1613_p5 }
  0x51   : > { %p1609_p12 = pneg %p1608_p13 }
  0x53   : > { %p1616_p2 = pnand %p1615_p1, %p1609_p12 }
  0x55   : > { %1619 = shalt.err (!%p1616_p2)
}
  0x56   : > { %1388 = dma.hbm_to_vmem [thread:$0]  (!%p1861_p0), %s308_s1, 128, %s311_s13, %s1873_s8  }
  0x57   : > { %s350_s26 = scalar_lea.hbm %s2322_s4, %s1857_s15  ;;  %s342_s11 = scalar_lea.vmem [#allocation10], %s1854_s14 }
  0x58   : > { %s352_s29 = sshll.u32 %s342_s11, 4  ;;  %s1742_s17 = smov [#allocation10]   ;;  %s353_s29 = int_to_ptr.vmem [resolvable:$true] %s352_s29 }
  0x59   : > { %s1633_s28 = scalar_lea.vmem %s353_s29, 128  ;;  %s1638_s3 = sshll.u32 %s1742_s17, 4  ;;  %s1639_s3 = int_to_ptr.vmem [resolvable:$false] %s1638_s3 }
  0x5a   : > { %p1634_p7 = scmp.ne.s32.totalorder %s353_s29, %s1633_s28  ;;  %s1640_s21 = scalar_lea.vmem %s1639_s3, 256 }
  0x5b   : > { %p1641_p12 = scmp.lt.s32.totalorder %s353_s29, %s1639_s3  ;;  %p1642_p5 = scmp.lt.s32.totalorder %s1640_s21, %s1633_s28 }
  0x5c   : > { %p1636_p10 = pnand %p1634_p7, %p1877_p3 }
  0x5d   : > { %p1643_p6 = por %p1642_p5, %p1641_p12 }
  0x5e   : > { %p1637_p13 = pneg %p1636_p10 }
  0x60   : > { %p1644_p1 = pnand %p1643_p6, %p1637_p13 }
  0x62   : > { %1647 = shalt.err (!%p1644_p1)
}
  0x63   : > { %1394 = dma.hbm_to_vmem [thread:$0]  (!%p1861_p0), %s350_s26, 128, %s353_s29, %s1899_s25  }
  0x64   : > { %373 = sbr.rel (%p1890_p4) target bundleno = 262 (0x106), region = 44  ;;  %s1940_s14 = sand.u32 (!%p1890_p4), 1, %s1720_s22  }
  0x65   : > { %s1943_s15 = sshll.u32 (!%p1890_p4), %s1940_s14, 3  ;;  %s376_s8 = scalar_lea.sflag (!%p1890_p4), [#allocation3], %s1940_s14 }
  0x66   : > { %s379_s7 = scalar_lea.vmem (!%p1890_p4), [#allocation2], %s1943_s15 }
  0x69   : > { %1699 = dma.done.wait (%p1834_p8), %s376_s8, 128  }
  0x6a   : > { %1701 = vsyncadd (%p1834_p8), %s376_s8, 4294967168  ;;  %s384_s25 = sand.u32 1, %s1814_s27   ;;  %s388_s18 = scalar_lea.vmem [#allocation5], %s1943_s15 }
  0x6b   : > { %s385_s16 = scalar_lea.sflag [#allocation6], %s384_s25 }
  0x6c   : > { %1703 = dma.done.wait (%p1834_p8), %s385_s16, 256  }
  0x6d   : > { %1705 = vsyncadd (%p1834_p8), %s385_s16, 4294967040  ;;  %s397_s1 = scalar_lea.vmem [#allocation7], %s1943_s15  ;;  %s403_s13 = scalar_lea.sflag [#allocation9], %s384_s25 }
  0x6e   : > { %s406_s12 = scalar_lea.vmem [#allocation8], %s1943_s15 }
  0x6f   : > { %1707 = dma.done.wait (%p1834_p8), %s403_s13, 256  }
  0x70   : > { %1709 = vsyncadd (%p1834_p8), %s403_s13, 4294967040  ;;  %p478_p0 = scmp.lt.s32.totalorder %s1728_s24, 1  ;;  %v491_v0 = vlaneseq  ;;  %vm507_vm0 = vcmask 1043456   ;;  %v503_v1 = vld [vmem:[%s379_s7] sm:$0xff]  ;;  %v1968_v2 = vld [vmem:[%s388_s18] sm:$0xff]  ;;  %s415_s9 = scalar_lea.vmem [#allocation10], %s1943_s15 }
  0x71   : > { %v1970_v4 = vcombine.high %v503_v1, %v503_v1  ;;  %v508_v5 = vsel %vm507_vm0, %v503_v1, -inf  ;;  %v1975_v6 = vcombine.high %v1968_v2, %v1968_v2  ;;  %v631_v9 = vsel %vm507_vm0, %v1968_v2, -inf  ;;  %v1989_v25 = vld [vmem:[%s397_s1] sm:$0xff]  ;;  %v2031_v62 = vld [vmem:[%s406_s12] sm:$0xff]  ;;  %s1345_s11 = sshll.u32 %s1940_s14, 5  ;;  %s1366_s17 = sshll.u32 %s1728_s24, 8 }
  0x72   : > { %s479_s27 = scalar_select %p478_p0, %s1728_s24, 1  ;;  %v1978_v7 = vshrl.u32 %v491_v0, 7  ;;  %v509_v8 = vrot.slane %v508_v5, 4  ;;  %v632_v11 = vrot.slane %v631_v9, 4  ;;  %v1994_v34 = vcombine.high %v1989_v25, %v1989_v25 }
  0x73   : > { %v515_v10 = vsel %vm507_vm0, %v1970_v4, -inf  ;;  %v638_v14 = vsel %vm507_vm0, %v1975_v6, -inf  ;;  %v751_v35 = vsel %vm507_vm0, %v1989_v25, -inf  ;;  %vm2170_vm4 = vcmp.lt.s32.totalorder %v491_v0, 256  ;;  %s2200_s29 = scalar_lea.vmem [#allocation11], %s1345_s11  ;;  %s2266_s15 = scalar_lea.hbm %s2324_s6, %s1366_s17 }
  0x74   : > { %s1346_s30 = sshll.u32 %s479_s27, 1  ;;  %v510_v12 = vmax.f32 %v508_v5, %v509_v8  ;;  %v516_v13 = vrot.slane %v515_v10, 4  ;;  %v633_v15 = vmax.f32 %v631_v9, %v632_v11  ;;  %v639_v16 = vrot.slane %v638_v14, 4  ;;  %s1122_s28 = sshll.u32 %s2200_s29, 4  ;;  %s2260_s28 = int_to_ptr.vmem [resolvable:$true] %s1122_s28 }
  0x75   : > { %s484_s26 = scalar_lea.vmem %s2323_s5, %s1346_s30  ;;  %v495_v17 = vsub.s32 0, %v1978_v7  ;;  %v499_v26 = vsub.s32 1, %v1978_v7  ;;  %v752_v43 = vrot.slane %v751_v35, 4  ;;  %v758_v45 = vsel %vm507_vm0, %v1994_v34, -inf  ;;  %s1108_s8 = scalar_lea.sflag [#allocation4], %s1940_s14 }
  0x76   : > { %v488_v3 = vld [vmem:[%s484_s26] sm:$0x3]  ;;  %v511_v18 = vrot.slane %v510_v12, 2  ;;  %v517_v19 = vmax.f32 %v515_v10, %v516_v13  ;;  %v634_v21 = vrot.slane %v633_v15, 2  ;;  %v640_v22 = vmax.f32 %v638_v14, %v639_v16  ;;  %s1648_s7 = scalar_lea.vmem %s2260_s28, 512  ;;  %s1744_s24 = smov [#allocation11]  }
  0x77   : > { %vm489_vm1 = vcmp.ne.s32.totalorder %v488_v3, 4294967295  ;;  %v753_v47 = vmax.f32 %v751_v35, %v752_v43  ;;  %v759_v51 = vrot.slane %v758_v45, 4  ;;  %v2036_v8 = vcombine.high %v2031_v62, %v2031_v62  ;;  %p1649_p8 = scmp.ne.s32.totalorder %s2260_s28, %s1648_s7  ;;  %s1652_s25 = sshll.u32 %s1744_s24, 4  ;;  %s1653_s25 = int_to_ptr.vmem [resolvable:$false] %s1652_s25 }
  0x78   : > { %v490_v20 = vsel %vm489_vm1, %v488_v3, 0  ;;  %v512_v23 = vmax.f32 %v510_v12, %v511_v18  ;;  %v518_v24 = vrot.slane %v517_v19, 2  ;;  %v635_v27 = vmax.f32 %v633_v15, %v634_v21  ;;  %s1654_s16 = scalar_lea.vmem %s1653_s25, 1024  ;;  %p1655_p2 = scmp.lt.s32.totalorder %s2260_s28, %s1653_s25 }
  0x79   : > { %v641_v28 = vrot.slane %v640_v22, 2  ;;  %v496_v29 = vrot.slane %v490_v20, %v495_v17  ;;  %v500_v38 = vrot.slane %v490_v20, %v499_v26  ;;  %v754_v53 = vrot.slane %v753_v47, 2  ;;  %p1650_p3 = pnand %p1649_p8, %p1838_p9  ;;  %p1656_p7 = scmp.lt.s32.totalorder %s1654_s16, %s1648_s7 }
  0x7a   : > { %v513_v30 = vrot.slane %v512_v23, 1  ;;  %v519_v31 = vmax.f32 %v517_v19, %v518_v24  ;;  %v636_v32 = vrot.slane %v635_v27, 1  ;;  %v760_v55 = vmax.f32 %v758_v45, %v759_v51  ;;  %v2050_v19 = vld [vmem:[%s415_s9] sm:$0xff] }
  0x7b   : > { %v642_v33 = vmax.f32 %v640_v22, %v641_v28  ;;  %vm2003_vm2 = vcmp.eq.s32.totalorder %v1978_v7, %v496_v29  ;;  %vm2016_vm3 = vcmp.eq.s32.totalorder %v1978_v7, %v500_v38  ;;  %v755_v59 = vmax.f32 %v753_v47, %v754_v53  ;;  %p1651_p4 = pneg %p1650_p3  ;;  %p1657_p10 = por %p1656_p7, %p1655_p2 }
  0x7c   : > { %v1998_v36 = vmax.f32 %v512_v23, %v513_v30  ;;  %v520_v37 = vrot.slane %v519_v31, 1  ;;  %v2000_v39 = vmax.f32 %v635_v27, %v636_v32  ;;  %v552_v49 = vsel %vm2003_vm2, %v503_v1, 0.0 }
  0x7d   : > { %v643_v40 = vrot.slane %v642_v33, 1  ;;  %v553_v57 = vsel %vm2016_vm3, %v1970_v4, 0.0  ;;  %v554_v58 = vsel %vm507_vm0, %v552_v49, 0.0  ;;  %v761_v61 = vrot.slane %v760_v55, 2  ;;  %p1658_p13 = pnand %p1657_p10, %p1651_p4 }
  0x7e   : > { %v2007_v42 = vmax.f32 %v519_v31, %v520_v37  ;;  %v756_v63 = vrot.slane %v755_v59, 1  ;;  %v561_v3 = vsel %vm507_vm0, %v553_v57, 0.0  ;;  %v871_v10 = vsel %vm507_vm0, %v2031_v62, -inf }
  0x7f   : > { %v2009_v44 = vmax.f32 %v642_v33, %v643_v40  ;;  %v762_v5 = vmax.f32 %v760_v55, %v761_v61  ;;  %v562_v11 = vrot.slane %v561_v3, 4  ;;  %v872_v12 = vrot.slane %v871_v10, 4 }
  0x80   : > { %v524_v46 = vcombine.low %v1998_v36, %v2007_v42  ;;  %v2038_v4 = vmax.f32 %v755_v59, %v756_v63  ;;  %v878_v13 = vsel %vm507_vm0, %v2036_v8, -inf  ;;  %v675_v15 = vsel %vm2003_vm2, %v1968_v2, 0.0 }
  0x81   : > { %v647_v50 = vcombine.low %v2000_v39, %v2009_v44  ;;  %v763_v9 = vrot.slane %v762_v5, 1  ;;  %v879_v17 = vrot.slane %v878_v13, 4  ;;  %v873_v18 = vmax.f32 %v871_v10, %v872_v12 }
  0x82   : > { %v526_v52 = vsub.f32 %v503_v1, %v524_v46  ;;  %v555_v1 = vrot.slane %v554_v58, 4  ;;  %v676_v20 = vsel %vm2016_vm3, %v1975_v6, 0.0  ;;  %v991_v23 = vsel %vm507_vm0, %v2050_v19, -inf }
  0x83   : > { %v649_v54 = vsub.f32 %v1968_v2, %v647_v50  ;;  %v2047_v16 = vmax.f32 %v762_v5, %v763_v9  ;;  %v880_v22 = vmax.f32 %v878_v13, %v879_v17  ;;  %v563_v24 = vadd.f32 %v562_v11, %v561_v3 }
  0x84   : > { %v527_v56 = vmul.f32 1.442695, %v526_v52  ;;  %v556_v14 = vadd.f32 %v555_v1, %v554_v58  ;;  %v677_v2 = vsel %vm507_vm0, %v675_v15, 0.0  ;;  %v874_v26 = vrot.slane %v873_v18, 2 }
  0x85   : > { %v650_v60 = vmul.f32 1.442695, %v649_v54  ;;  %v767_v21 = vcombine.low %v2038_v4, %v2047_v16  ;;  %v881_v29 = vrot.slane %v880_v22, 2  ;;  %v992_v30 = vrot.slane %v991_v23, 4 }
  0x86   : > { %1458 = vpow2.f32 %v527_v56  ;;  %v557_v27 = vrot.slane %v556_v14, 2  ;;  %v684_v31 = vsel %vm507_vm0, %v676_v20, 0.0  ;;  %v875_v32 = vmax.f32 %v873_v18, %v874_v26 }
  0x87   : > { %1460 = vpow2.f32 %v650_v60  ;;  %v769_v28 = vsub.f32 %v1989_v25, %v767_v21  ;;  %v882_v33 = vmax.f32 %v880_v22, %v881_v29  ;;  %v564_v35 = vrot.slane %v563_v24, 2 }
  0x88   : > { %v678_v37 = vrot.slane %v677_v2, 4  ;;  %v876_v38 = vrot.slane %v875_v32, 1  ;;  %v993_v40 = vmax.f32 %v991_v23, %v992_v30  ;;  %v2062_v45 = vadd.f32 %v557_v27, %v556_v14 }
  0x89   : > { %v770_v6 = vmul.f32 1.442695, %v769_v28  ;;  %v685_v46 = vrot.slane %v684_v31, 4  ;;  %v883_v47 = vrot.slane %v882_v33, 1  ;;  %v2069_v53 = vcombine.high %v2050_v19, %v2050_v19 }
  0x8a   : > { %v2065_v52 = vmax.f32 %v875_v32, %v876_v38  ;;  %v679_v60 = vadd.f32 %v678_v37, %v677_v2  ;;  %v994_v61 = vrot.slane %v993_v40, 2  ;;  %v2078_v9 = vadd.f32 %v564_v35, %v563_v24 }
  0x8b   : > { %1462 = vpow2.f32 %v770_v6  ;;  %v2072_v57 = vmax.f32 %v882_v33, %v883_v47  ;;  %v686_v12 = vadd.f32 %v685_v46, %v684_v31  ;;  %v998_v17 = vsel %vm507_vm0, %v2069_v53, -inf }
  0x8c   : > { %v680_v21 = vrot.slane %v679_v60, 2  ;;  %v995_v22 = vmax.f32 %v993_v40, %v994_v61  ;;  %v999_v27 = vrot.slane %v998_v17, 4  ;;  %v559_v24 = vrot.slane %v2062_v45, 1 }
  0x8d   : > { %v887_v5 = vcombine.low %v2065_v52, %v2072_v57  ;;  %v795_v30 = vsel %vm2003_vm2, %v1989_v25, 0.0  ;;  %v687_v38 = vrot.slane %v686_v12, 2 }
  0x8e   : > { %v1000_v6 = vmax.f32 %v998_v17, %v999_v27  ;;  %v681_v37 = vadd.f32 %v680_v21, %v679_v60  ;;  %v996_v46 = vrot.slane %v995_v22, 1  ;;  %v797_v25 = vsel %vm507_vm0, %v795_v30, 0.0 }
  0x8f   : > { %v889_v15 = vsub.f32 %v2031_v62, %v887_v5  ;;  %v798_v21 = vrot.slane %v797_v25, 4 }
  0x90   : > { %v1001_v47 = vrot.slane %v1000_v6, 2 }
  0x91   : > { %v890_v26 = vmul.f32 1.442695, %v889_v15 }
  0x92   : > { %v1002_v61 = vmax.f32 %v1000_v6, %v1001_v47 }
  0x93   : > { %v1459_v43 = vpop.eup %1458  ;;  %1464 = vpow2.f32 %v890_v26 }
  0x94   : > { %v1461_v49 = vpop.eup %1460  ;;  %v530_v50 = vcombine.high %v1459_v43, %v1459_v43  ;;  %v532_v51 = vsel %vm507_vm0, %v1459_v43, 0.0 }
  0x95   : > { %v533_v54 = vrot.slane %v532_v51, 4  ;;  %v653_v55 = vcombine.high %v1461_v49, %v1461_v49  ;;  %v655_v56 = vsel %vm507_vm0, %v1461_v49, 0.0 }
  0x96   : > { %v539_v58 = vsel %vm507_vm0, %v530_v50, 0.0  ;;  %v656_v59 = vrot.slane %v655_v56, 4 }
  0x97   : > { %v534_v63 = vadd.f32 %v533_v54, %v532_v51  ;;  %v540_v1 = vrot.slane %v539_v58, 4  ;;  %v662_v3 = vsel %vm507_vm0, %v653_v55, 0.0  ;;  %v796_v54 = vsel %vm2016_vm3, %v1994_v34, 0.0 }
  0x98   : > { %v657_v10 = vadd.f32 %v656_v59, %v655_v56  ;;  %v663_v11 = vrot.slane %v662_v3, 4  ;;  %v1463_v49 = vpop.eup %1462 }
  0x99   : > { %v535_v13 = vrot.slane %v534_v63, 2  ;;  %v541_v14 = vadd.f32 %v540_v1, %v539_v58  ;;  %v773_v56 = vcombine.high %v1463_v49, %v1463_v49  ;;  %v775_v58 = vsel %vm507_vm0, %v1463_v49, 0.0 }
  0x9a   : > { %v658_v18 = vrot.slane %v657_v10, 2  ;;  %v664_v20 = vadd.f32 %v663_v11, %v662_v3  ;;  %v776_v60 = vrot.slane %v775_v58, 4  ;;  %v804_v1 = vsel %vm507_vm0, %v796_v54, 0.0 }
  0x9b   : > { %v536_v23 = vadd.f32 %v535_v13, %v534_v63  ;;  %v542_v2 = vrot.slane %v541_v14, 2  ;;  %v782_v63 = vsel %vm507_vm0, %v773_v56, 0.0  ;;  %v2094_v3 = vmax.f32 %v995_v22, %v996_v46 }
  0x9c   : > { %v659_v28 = vadd.f32 %v658_v18, %v657_v10  ;;  %v665_v29 = vrot.slane %v664_v20, 2  ;;  %v777_v34 = vadd.f32 %v776_v60, %v775_v58  ;;  %v783_v5 = vrot.slane %v782_v63, 4 }
  0x9d   : > { %v537_v31 = vrot.slane %v536_v23, 1  ;;  %v543_v32 = vadd.f32 %v542_v2, %v541_v14  ;;  %v1003_v10 = vrot.slane %v1002_v61, 1  ;;  %v566_v11 = vrot.slane %v2078_v9, 1 }
  0x9e   : > { %v660_v33 = vrot.slane %v659_v28, 1  ;;  %v666_v35 = vadd.f32 %v665_v29, %v664_v20  ;;  %v682_v13 = vrot.slane %v681_v37, 1  ;;  %v688_v14 = vadd.f32 %v687_v38, %v686_v12 }
  0x9f   : > { %v538_v40 = vadd.f32 %v537_v31, %v536_v23  ;;  %v544_v43 = vrot.slane %v543_v32, 1  ;;  %v778_v15 = vrot.slane %v777_v34, 2  ;;  %v784_v17 = vadd.f32 %v783_v5, %v782_v63 }
  0xa0   : > { %v661_v50 = vadd.f32 %v660_v33, %v659_v28  ;;  %v667_v51 = vrot.slane %v666_v35, 1  ;;  %v915_v18 = vsel %vm2003_vm2, %v2031_v62, 0.0  ;;  %v2100_v20 = vmax.f32 %v1002_v61, %v1003_v10  ;;  %v1465_v31 = vpop.eup %1464 }
  0xa1   : > { %v545_v55 = vadd.f32 %v544_v43, %v543_v32  ;;  %1466 = vlog2.f32 %v538_v40  ;;  %v805_v23 = vrot.slane %v804_v1, 4  ;;  %v916_v22 = vsel %vm2016_vm3, %v2036_v8, 0.0 }
  0xa2   : > { %v668_v59 = vadd.f32 %v667_v51, %v666_v35  ;;  %1468 = vlog2.f32 %v661_v50  ;;  %v2106_v2 = vadd.f32 %v559_v24, %v2062_v45  ;;  %v779_v26 = vadd.f32 %v778_v15, %v777_v34 }
  0xa3   : > { %1470 = vlog2.f32 %v545_v55  ;;  %v785_v27 = vrot.slane %v784_v17, 2  ;;  %v1007_v12 = vcombine.low %v2094_v3, %v2100_v20  ;;  %v2111_v28 = vadd.f32 %v566_v11, %v2078_v9 }
  0xa4   : > { %1472 = vlog2.f32 %v668_v59  ;;  %v2113_v62 = vadd.f32 %v682_v13, %v681_v37  ;;  %v689_v29 = vrot.slane %v688_v14, 1  ;;  %v917_v30 = vsel %vm507_vm0, %v915_v18, 0.0 }
  0xa5   : > { %v780_v32 = vrot.slane %v779_v26, 1  ;;  %v786_v6 = vadd.f32 %v785_v27, %v784_v17  ;;  %v924_v8 = vsel %vm507_vm0, %v916_v22, 0.0  ;;  %v1009_v45 = vsub.f32 %v2050_v19, %v1007_v12 }
  0xa6   : > { %v799_v24 = vadd.f32 %v798_v21, %v797_v25  ;;  %v806_v33 = vadd.f32 %v805_v23, %v804_v1  ;;  %v893_v35 = vcombine.high %v1465_v31, %v1465_v31  ;;  %v895_v38 = vsel %vm507_vm0, %v1465_v31, 0.0 }
  0xa7   : > { %v781_v40 = vadd.f32 %v780_v32, %v779_v26  ;;  %v787_v9 = vrot.slane %v786_v6, 1  ;;  %v896_v43 = vrot.slane %v895_v38, 4  ;;  %v1010_v37 = vmul.f32 1.442695, %v1009_v45 }
  0xa8   : > { %v2119_v46 = vadd.f32 %v689_v29, %v688_v14  ;;  %v902_v47 = vsel %vm507_vm0, %v893_v35, 0.0  ;;  %v918_v49 = vrot.slane %v917_v30, 4  ;;  %v925_v50 = vrot.slane %v924_v8, 4 }
  0xa9   : > { %v788_v54 = vadd.f32 %v787_v9, %v786_v6  ;;  %1474 = vlog2.f32 %v781_v40  ;;  %v897_v55 = vadd.f32 %v896_v43, %v895_v38  ;;  %v903_v56 = vrot.slane %v902_v47, 4 }
  0xaa   : > { %v800_v59 = vrot.slane %v799_v24, 2  ;;  %v807_v60 = vrot.slane %v806_v33, 2  ;;  %1476 = vpow2.f32 %v1010_v37  ;;  %v919_v13 = vadd.f32 %v918_v49, %v917_v30 }
  0xab   : > { %1478 = vlog2.f32 %v788_v54  ;;  %v898_v1 = vrot.slane %v897_v55, 2  ;;  %v904_v34 = vadd.f32 %v903_v56, %v902_v47  ;;  %v926_v14 = vadd.f32 %v925_v50, %v924_v8 }
  0xac   : > { %v1743_v26 = vmov 1966171168   ;;  %v801_v12 = vadd.f32 %v800_v59, %v799_v24  ;;  %v808_v30 = vadd.f32 %v807_v60, %v806_v33  ;;  %v1035_v6 = vsel %vm2003_vm2, %v2050_v19, 0.0 }
  0xad   : > { %v899_v18 = vadd.f32 %v898_v1, %v897_v55  ;;  %v905_v21 = vrot.slane %v904_v34, 2  ;;  %v586_v27 = vunpack.c.l.s4 %v1743_v26  ;;  %v927_v24 = vrot.slane %v926_v14, 2 }
  0xae   : > { %v1467_v51 = vpop.eup %1466  ;;  %v802_v9 = vrot.slane %v801_v12, 1  ;;  %v1037_v43 = vsel %vm507_vm0, %v1035_v6, 0.0  ;;  %v809_v37 = vrot.slane %v808_v30, 1 }
  0xaf   : > { %v1469_v25 = vpop.eup %1468  ;;  %v547_v58 = vmul.f32 0.6931472, %v1467_v51  ;;  %v928_v49 = vadd.f32 %v927_v24, %v926_v14  ;;  %v1038_v50 = vrot.slane %v1037_v43, 4  ;;  %v587_v54 = vunpack.c.0.s8 %v586_v27 }
  0xb0   : > { %v1471_v61 = vpop.eup %1470  ;;  %v670_v63 = vmul.f32 0.6931472, %v1469_v25  ;;  %v2146_v56 = vadd.f32 %v802_v9, %v801_v12 }
  0xb1   : > { %v1473_v5 = vpop.eup %1472  ;;  %v549_v10 = vmul.f32 0.6931472, %v1471_v61  ;;  %v2123_v11 = vadd.f32 %v547_v58, %v1998_v36  ;;  %v2148_v58 = vadd.f32 %v809_v37, %v808_v30  ;;  %v1036_v61 = vsel %vm2016_vm3, %v2069_v53, 0.0 }
  0xb2   : > { %v672_v15 = vmul.f32 0.6931472, %v1473_v5  ;;  %v2126_v17 = vadd.f32 %v670_v63, %v2000_v39  ;;  %v900_v39 = vrot.slane %v899_v18, 1  ;;  %v2158_v14 = vadd.f32 %v1038_v50, %v1037_v43 }
  0xb3   : > { %v2129_v23 = vadd.f32 %v549_v10, %v2007_v42  ;;  %v570_v22 = vsub.f32 %v2106_v2, %v2123_v11  ;;  %v906_v42 = vadd.f32 %v905_v21, %v904_v34  ;;  %v929_v10 = vrot.slane %v928_v49, 1 }
  0xb4   : > { %v2134_v36 = vadd.f32 %v672_v15, %v2009_v44  ;;  %v693_v29 = vsub.f32 %v2113_v62, %v2126_v17  ;;  %v920_v44 = vrot.slane %v919_v13, 2  ;;  %v901_v38 = vadd.f32 %v900_v39, %v899_v18 }
  0xb5   : > { %v571_v31 = vsub.f32 %v2111_v28, %v2129_v23  ;;  %v572_v32 = vmul.f32 1.442695, %v570_v22  ;;  %v907_v33 = vrot.slane %v906_v42, 1  ;;  %v1044_v48 = vsel %vm507_vm0, %v1036_v61, 0.0 }
  0xb6   : > { %v694_v8 = vsub.f32 %v2119_v46, %v2134_v36  ;;  %v695_v45 = vmul.f32 1.442695, %v693_v29  ;;  %v921_v41 = vadd.f32 %v920_v44, %v919_v13  ;;  %v1475_v19 = vpop.eup %1474  ;;  %v2167_v53 = vsub.s32 %v587_v54, %v1978_v7 }
  0xb7   : > { %1480 = vpow2.f32 %v572_v32  ;;  %v574_v35 = vmul.f32 1.442695, %v571_v31  ;;  %v908_v47 = vadd.f32 %v907_v33, %v906_v42  ;;  %v1477_v51 = vpop.eup %1476  ;;  %v790_v55 = vmul.f32 0.6931472, %v1475_v19 }
  0xb8   : > { %1482 = vpow2.f32 %v695_v45  ;;  %v697_v40 = vmul.f32 1.442695, %v694_v8  ;;  %v1479_v25 = vpop.eup %1478  ;;  %v1013_v59 = vcombine.high %v1477_v51, %v1477_v51  ;;  %v1015_v60 = vsel %vm507_vm0, %v1477_v51, 0.0 }
  0xb9   : > { %1484 = vpow2.f32 %v574_v35  ;;  %v792_v63 = vmul.f32 0.6931472, %v1479_v25  ;;  %v2155_v1 = vadd.f32 %v790_v55, %v2038_v4  ;;  %v922_v34 = vrot.slane %v921_v41, 1 }
  0xba   : > { %1486 = vpow2.f32 %v697_v40  ;;  %v1016_v5 = vrot.slane %v1015_v60, 4  ;;  %v1022_v13 = vsel %vm507_vm0, %v1013_v59, 0.0  ;;  %v2178_v29 = vadd.f32 %v929_v10, %v928_v49 }
  0xbb   : > { %1488 = vlog2.f32 %v901_v38  ;;  %v2161_v15 = vadd.f32 %v792_v63, %v2047_v16  ;;  %v813_v18 = vsub.f32 %v2146_v56, %v2155_v1  ;;  %v1023_v4 = vrot.slane %v1022_v13, 4 }
  0xbc   : > { %1490 = vlog2.f32 %v908_v47  ;;  %v1017_v21 = vadd.f32 %v1016_v5, %v1015_v60  ;;  %v2176_v27 = vadd.f32 %v922_v34, %v921_v41  ;;  %v1040_v39 = vrot.slane %v2158_v14, 2 }
  0xbd   : > { %v814_v26 = vsub.f32 %v2148_v58, %v2161_v15  ;;  %v815_v16 = vmul.f32 1.442695, %v813_v18  ;;  %v1024_v30 = vadd.f32 %v1023_v4, %v1022_v13  ;;  %v1045_v7 = vrot.slane %v1044_v48, 4 }
  0xbe   : > { %v1018_v12 = vrot.slane %v1017_v21, 2  ;;  %v568_v0 = vsub.f32 %v2123_v11, %v2106_v2  ;;  %v569_v8 = vsub.f32 %v2129_v23, %v2111_v28  ;;  %v691_v44 = vsub.f32 %v2126_v17, %v2113_v62 }
  0xbf   : > { %1492 = vpow2.f32 %v815_v16  ;;  %v817_v32 = vmul.f32 1.442695, %v814_v26  ;;  %v1025_v24 = vrot.slane %v1024_v30, 2  ;;  %v692_v38 = vsub.f32 %v2134_v36, %v2119_v46 }
  0xc0   : > { %v1019_v42 = vadd.f32 %v1018_v12, %v1017_v21  ;;  %v1046_v18 = vadd.f32 %v1045_v7, %v1044_v48  ;;  %v1041_v48 = vadd.f32 %v1040_v39, %v2158_v14 }
  0xc1   : > { %1494 = vpow2.f32 %v817_v32  ;;  %v1026_v37 = vadd.f32 %v1025_v24, %v1024_v30  ;;  %v811_v32 = vsub.f32 %v2155_v1, %v2146_v56 }
  0xc2   : > { %v1020_v40 = vrot.slane %v1019_v42, 1  ;;  %v1047_v7 = vrot.slane %v1046_v18, 2  ;;  %v1042_v1 = vrot.slane %v1041_v48, 1 }
  0xc3   : > { %v1027_v61 = vrot.slane %v1026_v37, 1 }
  0xc4   : > { %v1481_v31 = vpop.eup %1480  ;;  %v1021_v19 = vadd.f32 %v1020_v40, %v1019_v42 }
  0xc5   : > { %v1483_v6 = vpop.eup %1482  ;;  %v576_v45 = vsub.f32 1.0, %v1481_v31  ;;  %v1028_v13 = vadd.f32 %v1027_v61, %v1026_v37 }
  0xc6   : > { %v1485_v35 = vpop.eup %1484  ;;  %v699_v33 = vsub.f32 1.0, %v1483_v6  ;;  %1496 = vlog2.f32 %v1021_v19 }
  0xc7   : > { %v1487_v2 = vpop.eup %1486  ;;  %v577_v11 = vsub.f32 1.0, %v1485_v35  ;;  %v578_v9 = vmul.f32 %v576_v45, %v576_v45  ;;  %v608_v43 = vcombine.low %v1481_v31, %v1485_v35  ;;  %1498 = vlog2.f32 %v1028_v13 }
  0xc8   : > { %v1489_v47 = vpop.eup %1488  ;;  %v700_v28 = vsub.f32 1.0, %v1487_v2  ;;  %v701_v23 = vmul.f32 %v699_v33, %v699_v33  ;;  %v728_v41 = vcombine.low %v1483_v6, %v1487_v2 }
  0xc9   : > { %v1491_v62 = vpop.eup %1490  ;;  %v579_v17 = vmul.f32 %v577_v11, %v577_v11  ;;  %v580_v49 = vmul.f32 %v578_v9, %v568_v0  ;;  %v615_v50 = vrot.slane %v608_v43, %v2167_v53  ;;  %v910_v46 = vmul.f32 0.6931472, %v1489_v47 }
  0xca   : > { %v702_v36 = vmul.f32 %v700_v28, %v700_v28  ;;  %v703_v51 = vmul.f32 %v701_v23, %v691_v44  ;;  %v735_v54 = vrot.slane %v728_v41, %v2167_v53  ;;  %v912_v55 = vmul.f32 0.6931472, %v1491_v62 }
  0xcb   : > { %v581_v25 = vmul.f32 %v579_v17, %v569_v8  ;;  %v622_v59 = vrot.slane %v615_v50, %v2167_v53  ;;  %v2194_v60 = vadd.f32 %v910_v46, %v2065_v52  ;;  %v812_v8 = vsub.f32 %v2161_v15, %v2148_v58 }
  0xcc   : > { %v704_v63 = vmul.f32 %v702_v36, %v692_v38  ;;  %v742_v34 = vrot.slane %v735_v54, %v2167_v53  ;;  %v2198_v5 = vadd.f32 %v912_v55, %v2072_v57  ;;  %v1493_v30 = vpop.eup %1492  ;;  %v1048_v44 = vadd.f32 %v1047_v7, %v1046_v18 }
  0xcd   : > { %v584_v10 = vcombine.low %v580_v49, %v581_v25  ;;  %1347 = vst.msk [vmem:[%s2200_s29 + $0x5] ss:$8 sm:$0x3] %vm2170_vm4, %v622_v59  ;;  %v933_v52 = vsub.f32 %v2176_v27, %v2194_v60  ;;  %v819_v42 = vsub.f32 1.0, %v1493_v30  ;;  %v1043_v15 = vadd.f32 %v1042_v1, %v1041_v48 }
  0xce   : > { %v707_v21 = vcombine.low %v703_v51, %v704_v63  ;;  %1349 = vst.msk [vmem:[%s2200_s29 + $0x6] ss:$8 sm:$0x3] %vm2170_vm4, %v742_v34  ;;  %v934_v57 = vsub.f32 %v2178_v29, %v2198_v5  ;;  %v1495_v6 = vpop.eup %1494  ;;  %v1049_v2 = vrot.slane %v1048_v44, 1  ;;  %v931_v17 = vsub.f32 %v2194_v60, %v2176_v27 }
  0xcf   : > { %v591_v4 = vrot.slane %v584_v10, %v2167_v53  ;;  %v935_v26 = vmul.f32 1.442695, %v933_v52  ;;  %v820_v14 = vsub.f32 1.0, %v1495_v6  ;;  %v821_v39 = vmul.f32 %v819_v42, %v819_v42 }
  0xd0   : > { %v714_v16 = vrot.slane %v707_v21, %v2167_v53  ;;  %v937_v12 = vmul.f32 1.442695, %v934_v57  ;;  %v848_v45 = vcombine.low %v1493_v30, %v1495_v6  ;;  %v1050_v28 = vadd.f32 %v1049_v2, %v1048_v44 }
  0xd1   : > { %v598_v31 = vrot.slane %v591_v4, %v2167_v53  ;;  %1500 = vpow2.f32 %v935_v26  ;;  %v822_v24 = vmul.f32 %v820_v14, %v820_v14  ;;  %v823_v35 = vmul.f32 %v821_v39, %v811_v32 }
  0xd2   : > { %v721_v0 = vrot.slane %v714_v16, %v2167_v53  ;;  %1502 = vpow2.f32 %v937_v12  ;;  %v855_v56 = vrot.slane %v848_v45, %v2167_v53 }
  0xd3   : > { %604 = vst.msk [vmem:[%s2200_s29] ss:$8 sm:$0x3] %vm2170_vm4, %v598_v31  ;;  %v824_v38 = vmul.f32 %v822_v24, %v812_v8  ;;  %v1497_v40 = vpop.eup %1496 }
  0xd4   : > { %1348 = vst.msk [vmem:[%s2200_s29 + $0x1] ss:$8 sm:$0x3] %vm2170_vm4, %v721_v0  ;;  %v862_v33 = vrot.slane %v855_v56, %v2167_v53  ;;  %v1030_v58 = vmul.f32 0.6931472, %v1497_v40  ;;  %v1499_v9 = vpop.eup %1498 }
  0xd5   : > { %v827_v11 = vcombine.low %v823_v35, %v824_v38  ;;  %v1032_v47 = vmul.f32 0.6931472, %v1499_v9 }
  0xd6   : > { %1351 = vst.msk [vmem:[%s2200_s29 + $0x7] ss:$8 sm:$0x3] %vm2170_vm4, %v862_v33  ;;  %v1033_v37 = vadd.f32 %v1030_v58, %v2094_v3  ;;  %v932_v3 = vsub.f32 %v2198_v5, %v2178_v29 }
  0xd7   : > { %v834_v43 = vrot.slane %v827_v11, %v2167_v53  ;;  %v1034_v50 = vadd.f32 %v1032_v47, %v2100_v20 }
  0xd8   : > { %v1053_v19 = vsub.f32 %v1043_v15, %v1033_v37  ;;  %v1051_v52 = vsub.f32 %v1033_v37, %v1043_v15 }
  0xd9   : > { %v841_v41 = vrot.slane %v834_v43, %v2167_v53  ;;  %v1054_v55 = vsub.f32 %v1050_v28, %v1034_v50  ;;  %v1052_v21 = vsub.f32 %v1034_v50, %v1050_v28 }
  0xda   : > { %v1055_v51 = vmul.f32 1.442695, %v1053_v19 }
  0xdb   : > { %1350 = vst.msk [vmem:[%s2200_s29 + $0x2] ss:$8 sm:$0x3] %vm2170_vm4, %v841_v41  ;;  %v1057_v60 = vmul.f32 1.442695, %v1054_v55 }
  0xdc   : > { %1504 = vpow2.f32 %v1055_v51 }
  0xdd   : > { %1506 = vpow2.f32 %v1057_v60 }
  0xde   : > { %v1501_v23 = vpop.eup %1500 }
  0xdf   : > { %v1503_v62 = vpop.eup %1502  ;;  %v939_v49 = vsub.f32 1.0, %v1501_v23 }
  0xe0   : > { %v940_v46 = vsub.f32 1.0, %v1503_v62  ;;  %v968_v36 = vcombine.low %v1501_v23, %v1503_v62 }
  0xe1   : > { %v941_v54 = vmul.f32 %v939_v49, %v939_v49 }
  0xe2   : > { %v942_v25 = vmul.f32 %v940_v46, %v940_v46  ;;  %v975_v59 = vrot.slane %v968_v36, %v2167_v53 }
  0xe3   : > { %v943_v27 = vmul.f32 %v941_v54, %v931_v17 }
  0xe4   : > { %v944_v20 = vmul.f32 %v942_v25, %v932_v3  ;;  %v982_v61 = vrot.slane %v975_v59, %v2167_v53 }
  0xe6   : > { %v947_v63 = vcombine.low %v943_v27, %v944_v20  ;;  %1353 = vst.msk [vmem:[%s2200_s29 + $0x10] ss:$8 sm:$0x3] %vm2170_vm4, %v982_v61 }
  0xe8   : > { %v954_v29 = vrot.slane %v947_v63, %v2167_v53 }
  0xe9   : > { %v1505_v5 = vpop.eup %1504 }
  0xea   : > { %v961_v34 = vrot.slane %v954_v29, %v2167_v53  ;;  %v1059_v10 = vsub.f32 1.0, %v1505_v5  ;;  %v1507_v13 = vpop.eup %1506 }
  0xeb   : > { %v1060_v57 = vsub.f32 1.0, %v1507_v13  ;;  %v1088_v4 = vcombine.low %v1505_v5, %v1507_v13 }
  0xec   : > { %1352 = vst.msk [vmem:[%s2200_s29 + $0x3] ss:$8 sm:$0x3] %vm2170_vm4, %v961_v34  ;;  %v1061_v18 = vmul.f32 %v1059_v10, %v1059_v10 }
  0xed   : > { %v1062_v26 = vmul.f32 %v1060_v57, %v1060_v57  ;;  %v1095_v12 = vrot.slane %v1088_v4, %v2167_v53 }
  0xee   : > { %v1063_v16 = vmul.f32 %v1061_v18, %v1051_v52 }
  0xef   : > { %v1064_v30 = vmul.f32 %v1062_v26, %v1052_v21  ;;  %v1102_v31 = vrot.slane %v1095_v12, %v2167_v53 }
  0xf1   : > { %v1067_v48 = vcombine.low %v1063_v16, %v1064_v30  ;;  %1355 = vst.msk [vmem:[%s2200_s29 + $0x11] ss:$8 sm:$0x3] %vm2170_vm4, %v1102_v31 }
  0xf3   : > { %v1074_v7 = vrot.slane %v1067_v48, %v2167_v53 }
  0xf5   : > { %v1081_v0 = vrot.slane %v1074_v7, %v2167_v53 }
  0xf7   : > { %1354 = vst.msk [vmem:[%s2200_s29 + $0x4] ss:$8 sm:$0x3] %vm2170_vm4, %v1081_v0 }
  0xf8   : > { %1661 = shalt.err (!%p1658_p13)
}
  0xf9   : > { %s1662_s18 = scalar_lea.hbm %s2266_s15, 512  ;;  %s1666_s12 = scalar_lea.hbm %s2324_s6, 1024 }
  0xfa   : > { %p1663_p12 = scmp.ne.s32.totalorder %s2266_s15, %s1662_s18  ;;  %p1667_p1 = scmp.lt.s32.totalorder %s2266_s15, %s2324_s6 }
  0xfb   : > { %p1668_p0 = scmp.lt.s32.totalorder %s1666_s12, %s1662_s18 }
  0xfc   : > { %p1664_p5 = pnand %p1663_p12, %p1838_p9 }
  0xfd   : > { %p1669_p8 = por %p1668_p0, %p1667_p1 }
  0xfe   : > { %p1665_p6 = pneg %p1664_p5 }
 0x100   : > { %p1670_p3 = pnand %p1669_p8, %p1665_p6 }
 0x102   : > { %1673 = shalt.err (!%p1670_p3)
}
 0x103   : > { %s1745_s19 = smov 256   ;;  %s1746_s20 = smov 512  }
 0x104   : > { %s1747_s26 = smov 16  }
 0x105   : > { %1377 = dma.vmem_to_hbm [thread:$0]  (%p1838_p9), %s2260_s28, 512, %s2266_s15, %s1108_s8, %s1745_s19, %s1746_s20, %s1747_s26  }
 0x106 PF: > { %s2356_s9 = sld [smem:[#allocation16_spill]] }
 0x107   : > { %s2358_s29 = sld [smem:[#allocation18_spill]] }
 0x10c   : > { %s1137_s17 = sand.u32 1, %s2356_s9  }
 0x10d   : > { %p2359_p4 = scmp.ge.s32.totalorder %s2358_s29, 2  ;;  %s1138_s3 = scalar_lea.sflag [#allocation4], %s1137_s17 }
 0x10f   : > { %p1396_p2 = pnand %p2359_p4, %p1845_p11 }
 0x111   : > { %p1397_p7 = pneg %p1396_p2 }
 0x113   : > { %1711 = dma.done.wait (%p1397_p7), %s1138_s3, 512  }
 0x114   : > { %1713 = vsyncadd (%p1397_p7), %s1138_s3, 4294966784  ;;  %s28_s26 = sadd.s32 1, %s2358_s29   ;;  %s2360_s10 = sld [smem:[#allocation20_spill]] }
 0x115   : > { %p25_p10 = scmp.ge.s32.totalorder %s28_s26, 4   ;;  %s2361_s24 = sld [smem:[#allocation17_spill]] }
 0x116   : > { %s2362_s25 = sld [smem:[#allocation19_spill]]  ;;  %s2363_s21 = smov %s1720_s22 }
 0x117   : > { %s2364_s22 = smov %s1724_s23  ;;  %27 = sbr.rel (!%p25_p10) target bundleno = 13 (0xd), region = 149 }
 0x11a   : > { %s2365_s23 = smov %s2360_s10 }
 0x11c   :  { %1143 = vsyncpa [#allocation3], 1 }
 0x11d   :  { %1145 = vsyncpa [#allocation3 + $0x1], 1 }
 0x11e   :  { %1146 = vsyncpa [#allocation6], 1 }
 0x11f   :  { %1148 = vsyncpa [#allocation6 + $0x1], 1 }
 0x120   :  { %1149 = vsyncpa [#allocation9], 1 }
 0x121   :  { %1151 = vsyncpa [#allocation9 + $0x1], 1 }
 0x122   :  { %1152 = vsyncpa [#allocation4], 1 }
 0x123   :  { %1154 = vsyncpa [#allocation4 + $0x1], 1 }

</bundles_post_ra>
